<compile_context>
chip_gen: v6e
topology: v6e:2x2x1
jax: 0.10.0
libtpu: 0.0.40
codegen_flags: <defaults>
</compile_context>

<pallas_src>
import functools
import inspect

import jax
import jax.numpy as jnp
from jax.experimental import pallas as pl
from jax.experimental.pallas import tpu as pltpu


def _supports_pipeline_mode():
    if not hasattr(pl, "Buffered"):
        return False
    try:
        return "pipeline_mode" in inspect.signature(pl.BlockSpec).parameters
    except (TypeError, ValueError):
        return False


_HAS_PIPELINE_MODE = _supports_pipeline_mode()


def _round_up(x, m):
    return ((x + m - 1) // m) * m


# ---------------------------------------------------------------------------
# Kernel
# ---------------------------------------------------------------------------
def _latent_action_kernel(
    xt_ref,                     # (TB, L)   input dtype  — x_t batch tile
    xt1_ref,                    # (TB, L)   input dtype  — x_t1 batch tile
    w1a_ref, w1b_ref, b1_ref,   # (L, Hp) bf16, (L, Hp) bf16, (1, Hp) f32
    w2_ref, b2_ref,             # (Hp, Hp) bf16, (1, Hp) f32
    w3_ref, b3_ref,             # (Hp, L) bf16, (1, L) f32
    out_ref,                    # (TB, L)   output dtype
):
    cdt = w1a_ref.dtype

    xt = xt_ref[...].astype(cdt)
    xt1 = xt1_ref[...].astype(cdt)

    # Layer 1: cat([x_t, x_t1], 1) @ W1 + b1 == x_t @ W1_top + x_t1 @ W1_bot + b1
    h = jnp.dot(xt, w1a_ref[...], preferred_element_type=jnp.float32)
    h = h + jnp.dot(xt1, w1b_ref[...], preferred_element_type=jnp.float32)
    h = jnp.maximum(h + b1_ref[...], 0.0)

    # Layer 2: Linear(H -> H) + ReLU
    h = jnp.dot(h.astype(cdt), w2_ref[...], preferred_element_type=jnp.float32)
    h = jnp.maximum(h + b2_ref[...], 0.0)

    # Layer 3: Linear(H -> L)
    out = jnp.dot(h.astype(cdt), w3_ref[...], preferred_element_type=jnp.float32)
    out_ref[...] = (out + b3_ref[...]).astype(out_ref.dtype)


# ---------------------------------------------------------------------------
# Parameter preparation (split W1, pad only the hidden dim, cast ONCE)
# ---------------------------------------------------------------------------
def prepare_params(params, latent_dim, hidden_dim, compute_dtype=jnp.bfloat16):
    """Split W1 into its x_t / x_t1 halves, zero-pad only the hidden (H)
    dimension to a multiple of 128 (it is the lane dim of h1/h2), and cast
    weights to the MXU compute dtype.  Biases stay f32."""
    L, H = latent_dim, hidden_dim
    h_p = _round_up(H, 128)

    def pad_to(a, rows, cols):
        r, c = a.shape
        return jnp.pad(a, ((0, rows - r), (0, cols - c)))

    w1 = params["w1"]  # (2L, H), stored as [in, out] (== W.T of the torch Linear)
    return {
        "w1a": pad_to(w1[:L], L, h_p).astype(compute_dtype),
        "w1b": pad_to(w1[L:], L, h_p).astype(compute_dtype),
        "b1": pad_to(params["b1"].reshape(1, H), 1, h_p).astype(jnp.float32),
        "w2": pad_to(params["w2"], h_p, h_p).astype(compute_dtype),
        "b2": pad_to(params["b2"].reshape(1, H), 1, h_p).astype(jnp.float32),
        "w3": pad_to(params["w3"], h_p, L).astype(compute_dtype),
        "b3": params["b3"].reshape(1, L).astype(jnp.float32),
        "latent_dim": L,
        "hidden_dim": H,
        "h_pad": h_p,
        "compute_dtype": compute_dtype,
    }


# ---------------------------------------------------------------------------
# Forward wrapper
# ---------------------------------------------------------------------------
def latent_action_generator_forward(x_t, x_t1, prepared, *, batch_tile=512,
                                    out_dtype=None, single_buffer_weights=True):
    """Fused forward pass of LatentActionGenerator.

    Args:
      x_t:  [B, latent_dim] current latent state.
      x_t1: [B, latent_dim] next latent state.
      prepared: output of prepare_params().
    Returns:
      latent_action: [B, latent_dim] in the caller's dtype.
    """
    B, L = x_t.shape
    assert L == prepared["latent_dim"]
    assert x_t1.shape == (B, L)
    h_p = prepared["h_pad"]
    cdt = prepared["compute_dtype"]
    out_dtype = x_t.dtype if out_dtype is None else out_dtype
    use_single_buffer = single_buffer_weights and _HAS_PIPELINE_MODE

    # Batch tile: multiple of 16 sublanes (bf16 packing), default 512 so each
    # grid step amortizes the ~0.35 us per-step pipeline overhead.
    tb = max(16, min(_round_up(batch_tile, 16), _round_up(B, 16)))
    # Prefer >= 2 grid steps when the batch allows it: v7x shards the
    # "parallel" batch axis across its 2 TensorCores (harmless on v5e/v6e).
    if _round_up(B, tb) == tb and tb >= 32:
        tb = _round_up(tb // 2, 16)
    b_pad = _round_up(B, tb)
    grid = (b_pad // tb,)

    # Only pad the batch when it is not tile-aligned (pad rows sliced off later).
    if b_pad != B:
        x_t_in = jnp.pad(x_t, ((0, b_pad - B), (0, 0)))
        x_t1_in = jnp.pad(x_t1, ((0, b_pad - B), (0, 0)))
    else:
        x_t_in, x_t1_in = x_t, x_t1

    # --- VMEM budget: derive from the chip, leave ~25% headroom -------------
    try:
        info = pltpu.get_tpu_info()
        vmem_cap = int(getattr(info, "vmem_capacity_bytes", 64 * 2**20))
    except Exception:  # interpret mode / older JAX: conservative fallback
        vmem_cap = 64 * 2**20
    vmem_budget = (vmem_cap * 3) // 4

    cdt_sz = jnp.dtype(cdt).itemsize
    in_sz = jnp.dtype(x_t.dtype).itemsize
    out_sz = jnp.dtype(out_dtype).itemsize
    weight_bytes_1buf = ((2 * L * h_p + h_p * h_p + h_p * L) * cdt_sz
                         + (2 * h_p + L) * 4)
    weight_bytes = (1 if use_single_buffer else 2) * weight_bytes_1buf
    io_bytes = 2 * tb * (2 * L * in_sz + L * out_sz)   # double-buffered x_t/x_t1/out
    act_bytes = 2 * tb * h_p * 4                       # f32 h1/h2 intermediates
    vmem_limit = int(min(vmem_budget,
                         max(32 * 2**20,
                             2 * (weight_bytes + io_bytes + act_bytes))))

    # Advisory cost estimate for XLA's scheduler.
    flops = 2 * b_pad * (2 * L * h_p + h_p * h_p + h_p * L)
    bytes_accessed = int(b_pad * 2 * L * in_sz + b_pad * L * out_sz
                         + weight_bytes_1buf)
    cost = pl.CostEstimate(flops=flops, transcendentals=0,
                           bytes_accessed=bytes_accessed)

    # Resident (grid-invariant) blocks: weights/biases.  Single-buffer them so
    # they are not pointlessly double-buffered in VMEM (critical on v7x).
    resident_kwargs = {}
    if use_single_buffer:
        resident_kwargs["pipeline_mode"] = pl.Buffered(buffer_count=1)

    def resident(shape):
        return pl.BlockSpec(shape, lambda i: (0, 0), **resident_kwargs)

    def stream(shape):
        return pl.BlockSpec(shape, lambda i: (i, 0))

    out = pl.pallas_call(
        _latent_action_kernel,
        out_shape=jax.ShapeDtypeStruct((b_pad, L), out_dtype),
        grid=grid,
        in_specs=[
            stream((tb, L)),            # x_t tile   (streamed)
            stream((tb, L)),            # x_t1 tile  (streamed)
            resident((L, h_p)),         # W1 top half  (VMEM-resident)
            resident((L, h_p)),         # W1 bottom half
            resident((1, h_p)),         # b1
            resident((h_p, h_p)),       # W2
            resident((1, h_p)),         # b2
            resident((h_p, L)),         # W3
            resident((1, L)),           # b3
        ],
        out_specs=stream((tb, L)),
        compiler_params=pltpu.CompilerParams(
            dimension_semantics=("parallel",),
            vmem_limit_bytes=vmem_limit,
        ),
        cost_estimate=cost,
    )(x_t_in, x_t1_in,
      prepared["w1a"], prepared["w1b"], prepared["b1"],
      prepared["w2"], prepared["b2"],
      prepared["w3"], prepared["b3"])

    return out if b_pad == B else out[:B]


# ---------------------------------------------------------------------------
# Synthetic parameters + pure-JAX reference
# ---------------------------------------------------------------------------
def init_params(key, latent_dim, hidden_dim, dtype=jnp.float32):
    """Deterministic synthetic parameters (stored as [in, out], like W.T)."""
    ks = jax.random.split(key, 6)
    s1 = 1.0 / jnp.sqrt(2.0 * latent_dim)
    s2 = 1.0 / jnp.sqrt(float(hidden_dim))
    return {
        "w1": jax.random.uniform(ks[0], (2 * latent_dim, hidden_dim), dtype, -s1, s1),
        "b1": jax.random.uniform(ks[1], (hidden_dim,), dtype, -s1, s1),
        "w2": jax.random.uniform(ks[2], (hidden_dim, hidden_dim), dtype, -s2, s2),
        "b2": jax.random.uniform(ks[3], (hidden_dim,), dtype, -s2, s2),
        "w3": jax.random.uniform(ks[4], (hidden_dim, latent_dim), dtype, -s2, s2),
        "b3": jax.random.uniform(ks[5], (latent_dim,), dtype, -s2, s2),
    }


def _reference_forward(x_t, x_t1, params, compute_dtype=jnp.bfloat16):
    """Pure-JAX reference matching the PyTorch module, with the same bf16
    matmul operands / f32 accumulation as the kernel.
    # TODO(synk): bf16 matmul is a deliberate numeric deviation from the f32
    # torch module; pass compute_dtype=jnp.float32 to prepare_params if exact
    # f32 semantics are required."""
    def mm(a, w):
        return jnp.dot(a.astype(compute_dtype), w.astype(compute_dtype),
                       preferred_element_type=jnp.float32)
    x = jnp.concatenate([x_t, x_t1], axis=1)
    h = jax.nn.relu(mm(x, params["w1"]) + params["b1"])
    h = jax.nn.relu(mm(h, params["w2"]) + params["b2"])
    return mm(h, params["w3"]) + params["b3"]


# ---------------------------------------------------------------------------
# Demo / self-check
# ---------------------------------------------------------------------------
if __name__ == "__main__":
    B, LATENT_DIM, HIDDEN_DIM = 2, 16, 32

    key = jax.random.PRNGKey(0)
    k_x, k_x1, k_p = jax.random.split(key, 3)
    x_t = jax.random.normal(k_x, (B, LATENT_DIM), jnp.float32)
    x_t1 = jax.random.normal(k_x1, (B, LATENT_DIM), jnp.float32)

    params = init_params(k_p, LATENT_DIM, HIDDEN_DIM)
    prepared = prepare_params(params, LATENT_DIM, HIDDEN_DIM)

    def run(single_buffer_weights):
        fn = jax.jit(functools.partial(
            latent_action_generator_forward, prepared=prepared,
            single_buffer_weights=single_buffer_weights))
        return jax.block_until_ready(fn(x_t, x_t1))

    try:
        out = run(True)    # v7x-friendly: single-buffered resident weights
    except Exception:
        out = run(False)   # fallback if this JAX build rejects Buffered(1)

    ref = _reference_forward(x_t, x_t1, params)
    assert out.shape == (B, LATENT_DIM), out.shape
    max_err = float(jnp.max(jnp.abs(out - ref)))
    assert jnp.allclose(out, ref, atol=1e-3, rtol=1e-3), f"max abs err = {max_err}"

    print("KERNEL_OK")
</pallas_src>

<mosaic_0001>
module attributes {stable_mosaic.version = 11 : i64} {
  func.func @_latent_action_kernel(%arg0: i32, %arg1: memref<16x16xf32, #tpu.memory_space<vmem>>, %arg2: memref<16x16xf32, #tpu.memory_space<vmem>>, %arg3: memref<16x128xbf16, #tpu.memory_space<vmem>>, %arg4: memref<16x128xbf16, #tpu.memory_space<vmem>>, %arg5: memref<1x128xf32, #tpu.memory_space<vmem>>, %arg6: memref<128x128xbf16, #tpu.memory_space<vmem>>, %arg7: memref<1x128xf32, #tpu.memory_space<vmem>>, %arg8: memref<128x16xbf16, #tpu.memory_space<vmem>>, %arg9: memref<1x16xf32, #tpu.memory_space<vmem>>, %arg10: memref<16x16xf32, #tpu.memory_space<vmem>>) attributes {dimension_semantics = [#tpu.dimension_semantics<parallel>], iteration_bounds = array<i64: 1>, scalar_prefetch = 0 : i64, scratch_operands = 0 : i64, tpu.core_type = #tpu.core_type<tc>, window_params = [{transform_indices = @transform_0, window_bounds = array<i64: 16, 16>}, {transform_indices = @transform_1, window_bounds = array<i64: 16, 16>}, {pipeline_mode = #tpu.pipeline_mode<synchronous>, transform_indices = @transform_2, window_bounds = array<i64: 16, 128>}, {pipeline_mode = #tpu.pipeline_mode<synchronous>, transform_indices = @transform_3, window_bounds = array<i64: 16, 128>}, {pipeline_mode = #tpu.pipeline_mode<synchronous>, transform_indices = @transform_4, window_bounds = array<i64: 1, 128>}, {pipeline_mode = #tpu.pipeline_mode<synchronous>, transform_indices = @transform_5, window_bounds = array<i64: 128, 128>}, {pipeline_mode = #tpu.pipeline_mode<synchronous>, transform_indices = @transform_6, window_bounds = array<i64: 1, 128>}, {pipeline_mode = #tpu.pipeline_mode<synchronous>, transform_indices = @transform_7, window_bounds = array<i64: 128, 16>}, {pipeline_mode = #tpu.pipeline_mode<synchronous>, transform_indices = @transform_8, window_bounds = array<i64: 1, 16>}, {transform_indices = @transform_9, window_bounds = array<i64: 16, 16>}]} {
    %c0 = arith.constant 0 : index
    %c0_0 = arith.constant 0 : index
    %0 = vector.load %arg1[%c0, %c0_0] : memref<16x16xf32, #tpu.memory_space<vmem>>, vector<16x16xf32>
    %1 = arith.truncf %0 : vector<16x16xf32> to vector<16x16xbf16>
    %c0_1 = arith.constant 0 : index
    %c0_2 = arith.constant 0 : index
    %2 = vector.load %arg2[%c0_1, %c0_2] : memref<16x16xf32, #tpu.memory_space<vmem>>, vector<16x16xf32>
    %3 = arith.truncf %2 : vector<16x16xf32> to vector<16x16xbf16>
    %c0_3 = arith.constant 0 : index
    %c0_4 = arith.constant 0 : index
    %4 = vector.load %arg3[%c0_3, %c0_4] : memref<16x128xbf16, #tpu.memory_space<vmem>>, vector<16x128xbf16>
    %cst = arith.constant dense<0.000000e+00> : vector<16x128xf32>
    %5 = tpu.matmul %1, %4, %cst {dimension_numbers = #tpu.dot_dimension_numbers<[1], [0], [0], [1], [0, 0, 1, 1], [], []>} : vector<16x16xbf16>, vector<16x128xbf16>, vector<16x128xf32> -> vector<16x128xf32>
    %c0_5 = arith.constant 0 : index
    %c0_6 = arith.constant 0 : index
    %6 = vector.load %arg4[%c0_5, %c0_6] : memref<16x128xbf16, #tpu.memory_space<vmem>>, vector<16x128xbf16>
    %cst_7 = arith.constant dense<0.000000e+00> : vector<16x128xf32>
    %7 = tpu.matmul %3, %6, %cst_7 {dimension_numbers = #tpu.dot_dimension_numbers<[1], [0], [0], [1], [0, 0, 1, 1], [], []>} : vector<16x16xbf16>, vector<16x128xbf16>, vector<16x128xf32> -> vector<16x128xf32>
    %8 = arith.addf %5, %7 : vector<16x128xf32>
    %c0_8 = arith.constant 0 : index
    %c0_9 = arith.constant 0 : index
    %9 = vector.load %arg5[%c0_8, %c0_9] : memref<1x128xf32, #tpu.memory_space<vmem>>, vector<1x128xf32>
    %10 = vector.broadcast %9 : vector<1x128xf32> to vector<16x128xf32>
    %11 = arith.addf %8, %10 : vector<16x128xf32>
    %cst_10 = arith.constant 0.000000e+00 : f32
    %12 = vector.broadcast %cst_10 : f32 to vector<16x128xf32>
    %13 = arith.maximumf %11, %12 : vector<16x128xf32>
    %14 = arith.truncf %13 : vector<16x128xf32> to vector<16x128xbf16>
    %c0_11 = arith.constant 0 : index
    %c0_12 = arith.constant 0 : index
    %15 = vector.load %arg6[%c0_11, %c0_12] : memref<128x128xbf16, #tpu.memory_space<vmem>>, vector<128x128xbf16>
    %cst_13 = arith.constant dense<0.000000e+00> : vector<16x128xf32>
    %16 = tpu.matmul %14, %15, %cst_13 {dimension_numbers = #tpu.dot_dimension_numbers<[1], [0], [0], [1], [0, 0, 1, 1], [], []>} : vector<16x128xbf16>, vector<128x128xbf16>, vector<16x128xf32> -> vector<16x128xf32>
    %c0_14 = arith.constant 0 : index
    %c0_15 = arith.constant 0 : index
    %17 = vector.load %arg7[%c0_14, %c0_15] : memref<1x128xf32, #tpu.memory_space<vmem>>, vector<1x128xf32>
    %18 = vector.broadcast %17 : vector<1x128xf32> to vector<16x128xf32>
    %19 = arith.addf %16, %18 : vector<16x128xf32>
    %cst_16 = arith.constant 0.000000e+00 : f32
    %20 = vector.broadcast %cst_16 : f32 to vector<16x128xf32>
    %21 = arith.maximumf %19, %20 : vector<16x128xf32>
    %22 = arith.truncf %21 : vector<16x128xf32> to vector<16x128xbf16>
    %c0_17 = arith.constant 0 : index
    %c0_18 = arith.constant 0 : index
    %23 = vector.load %arg8[%c0_17, %c0_18] : memref<128x16xbf16, #tpu.memory_space<vmem>>, vector<128x16xbf16>
    %cst_19 = arith.constant dense<0.000000e+00> : vector<16x16xf32>
    %24 = tpu.matmul %22, %23, %cst_19 {dimension_numbers = #tpu.dot_dimension_numbers<[1], [0], [0], [1], [0, 0, 1, 1], [], []>} : vector<16x128xbf16>, vector<128x16xbf16>, vector<16x16xf32> -> vector<16x16xf32>
    %c0_20 = arith.constant 0 : index
    %c0_21 = arith.constant 0 : index
    %25 = vector.load %arg9[%c0_20, %c0_21] : memref<1x16xf32, #tpu.memory_space<vmem>>, vector<1x16xf32>
    %26 = vector.broadcast %25 : vector<1x16xf32> to vector<16x16xf32>
    %27 = arith.addf %24, %26 : vector<16x16xf32>
    %c0_22 = arith.constant 0 : index
    %c0_23 = arith.constant 0 : index
    %28 = vector.load %arg10[%c0_22, %c0_23] : memref<16x16xf32, #tpu.memory_space<vmem>>, vector<16x16xf32>
    tpu.vector_store %arg10[%c0_22, %c0_23], %27 {strides = array<i32>} : memref<16x16xf32, #tpu.memory_space<vmem>>, vector<16x16xf32>,
    return
  }
  func.func @transform_0(%arg0: i32) -> (i32, i32) {
    %c0_i32 = arith.constant 0 : i32
    %c0_i32_0 = arith.constant 0 : i32
    return %arg0, %c0_i32 : i32, i32
  }
  func.func @transform_1(%arg0: i32) -> (i32, i32) {
    %c0_i32 = arith.constant 0 : i32
    %c0_i32_0 = arith.constant 0 : i32
    return %arg0, %c0_i32 : i32, i32
  }
  func.func @transform_2(%arg0: i32) -> (i32, i32) {
    %c0_i32 = arith.constant 0 : i32
    %c0_i32_0 = arith.constant 0 : i32
    %c0_i32_1 = arith.constant 0 : i32
    return %c0_i32, %c0_i32_0 : i32, i32
  }
  func.func @transform_3(%arg0: i32) -> (i32, i32) {
    %c0_i32 = arith.constant 0 : i32
    %c0_i32_0 = arith.constant 0 : i32
    %c0_i32_1 = arith.constant 0 : i32
    return %c0_i32, %c0_i32_0 : i32, i32
  }
  func.func @transform_4(%arg0: i32) -> (i32, i32) {
    %c0_i32 = arith.constant 0 : i32
    %c0_i32_0 = arith.constant 0 : i32
    %c0_i32_1 = arith.constant 0 : i32
    return %c0_i32, %c0_i32_0 : i32, i32
  }
  func.func @transform_5(%arg0: i32) -> (i32, i32) {
    %c0_i32 = arith.constant 0 : i32
    %c0_i32_0 = arith.constant 0 : i32
    %c0_i32_1 = arith.constant 0 : i32
    return %c0_i32, %c0_i32_0 : i32, i32
  }
  func.func @transform_6(%arg0: i32) -> (i32, i32) {
    %c0_i32 = arith.constant 0 : i32
    %c0_i32_0 = arith.constant 0 : i32
    %c0_i32_1 = arith.constant 0 : i32
    return %c0_i32, %c0_i32_0 : i32, i32
  }
  func.func @transform_7(%arg0: i32) -> (i32, i32) {
    %c0_i32 = arith.constant 0 : i32
    %c0_i32_0 = arith.constant 0 : i32
    %c0_i32_1 = arith.constant 0 : i32
    return %c0_i32, %c0_i32_0 : i32, i32
  }
  func.func @transform_8(%arg0: i32) -> (i32, i32) {
    %c0_i32 = arith.constant 0 : i32
    %c0_i32_0 = arith.constant 0 : i32
    %c0_i32_1 = arith.constant 0 : i32
    return %c0_i32, %c0_i32_0 : i32, i32
  }
  func.func @transform_9(%arg0: i32) -> (i32, i32) {
    %c0_i32 = arith.constant 0 : i32
    %c0_i32_0 = arith.constant 0 : i32
    return %arg0, %c0_i32 : i32, i32
  }
}

module attributes {stable_mosaic.version = 11 : i64} {
  func.func @_latent_action_kernel(%arg0: i32, %arg1: memref<16x16xf32, #tpu.memory_space<vmem>>, %arg2: memref<16x16xf32, #tpu.memory_space<vmem>>, %arg3: memref<16x128xbf16, #tpu.memory_space<vmem>>, %arg4: memref<16x128xbf16, #tpu.memory_space<vmem>>, %arg5: memref<1x128xf32, #tpu.memory_space<vmem>>, %arg6: memref<128x128xbf16, #tpu.memory_space<vmem>>, %arg7: memref<1x128xf32, #tpu.memory_space<vmem>>, %arg8: memref<128x16xbf16, #tpu.memory_space<vmem>>, %arg9: memref<1x16xf32, #tpu.memory_space<vmem>>, %arg10: memref<16x16xf32, #tpu.memory_space<vmem>>) attributes {dimension_semantics = [#tpu.dimension_semantics<parallel>], iteration_bounds = array<i64: 1>, scalar_prefetch = 0 : i64, scratch_operands = 0 : i64, tpu.core_type = #tpu.core_type<tc>, window_params = [{transform_indices = @transform_0, window_bounds = array<i64: 16, 16>}, {transform_indices = @transform_1, window_bounds = array<i64: 16, 16>}, {pipeline_mode = #tpu.pipeline_mode<synchronous>, transform_indices = @transform_2, window_bounds = array<i64: 16, 128>}, {pipeline_mode = #tpu.pipeline_mode<synchronous>, transform_indices = @transform_3, window_bounds = array<i64: 16, 128>}, {pipeline_mode = #tpu.pipeline_mode<synchronous>, transform_indices = @transform_4, window_bounds = array<i64: 1, 128>}, {pipeline_mode = #tpu.pipeline_mode<synchronous>, transform_indices = @transform_5, window_bounds = array<i64: 128, 128>}, {pipeline_mode = #tpu.pipeline_mode<synchronous>, transform_indices = @transform_6, window_bounds = array<i64: 1, 128>}, {pipeline_mode = #tpu.pipeline_mode<synchronous>, transform_indices = @transform_7, window_bounds = array<i64: 128, 16>}, {pipeline_mode = #tpu.pipeline_mode<synchronous>, transform_indices = @transform_8, window_bounds = array<i64: 1, 16>}, {transform_indices = @transform_9, window_bounds = array<i64: 16, 16>}]} {
    %c0 = arith.constant 0 : index
    %c0_0 = arith.constant 0 : index
    %0 = vector.load %arg1[%c0, %c0_0] : memref<16x16xf32, #tpu.memory_space<vmem>>, vector<16x16xf32>
    %1 = arith.truncf %0 : vector<16x16xf32> to vector<16x16xbf16>
    %c0_1 = arith.constant 0 : index
    %c0_2 = arith.constant 0 : index
    %2 = vector.load %arg2[%c0_1, %c0_2] : memref<16x16xf32, #tpu.memory_space<vmem>>, vector<16x16xf32>
    %3 = arith.truncf %2 : vector<16x16xf32> to vector<16x16xbf16>
    %c0_3 = arith.constant 0 : index
    %c0_4 = arith.constant 0 : index
    %4 = vector.load %arg3[%c0_3, %c0_4] : memref<16x128xbf16, #tpu.memory_space<vmem>>, vector<16x128xbf16>
    %cst = arith.constant dense<0.000000e+00> : vector<16x128xf32>
    %5 = tpu.matmul %1, %4, %cst {dimension_numbers = #tpu.dot_dimension_numbers<[1], [0], [0], [1], [0, 0, 1, 1], [], []>} : vector<16x16xbf16>, vector<16x128xbf16>, vector<16x128xf32> -> vector<16x128xf32>
    %c0_5 = arith.constant 0 : index
    %c0_6 = arith.constant 0 : index
    %6 = vector.load %arg4[%c0_5, %c0_6] : memref<16x128xbf16, #tpu.memory_space<vmem>>, vector<16x128xbf16>
    %cst_7 = arith.constant dense<0.000000e+00> : vector<16x128xf32>
    %7 = tpu.matmul %3, %6, %cst_7 {dimension_numbers = #tpu.dot_dimension_numbers<[1], [0], [0], [1], [0, 0, 1, 1], [], []>} : vector<16x16xbf16>, vector<16x128xbf16>, vector<16x128xf32> -> vector<16x128xf32>
    %8 = arith.addf %5, %7 : vector<16x128xf32>
    %c0_8 = arith.constant 0 : index
    %c0_9 = arith.constant 0 : index
    %9 = vector.load %arg5[%c0_8, %c0_9] : memref<1x128xf32, #tpu.memory_space<vmem>>, vector<1x128xf32>
    %10 = vector.broadcast %9 : vector<1x128xf32> to vector<16x128xf32>
    %11 = arith.addf %8, %10 : vector<16x128xf32>
    %cst_10 = arith.constant 0.000000e+00 : f32
    %12 = vector.broadcast %cst_10 : f32 to vector<16x128xf32>
    %13 = arith.maximumf %11, %12 : vector<16x128xf32>
    %14 = arith.truncf %13 : vector<16x128xf32> to vector<16x128xbf16>
    %c0_11 = arith.constant 0 : index
    %c0_12 = arith.constant 0 : index
    %15 = vector.load %arg6[%c0_11, %c0_12] : memref<128x128xbf16, #tpu.memory_space<vmem>>, vector<128x128xbf16>
    %cst_13 = arith.constant dense<0.000000e+00> : vector<16x128xf32>
    %16 = tpu.matmul %14, %15, %cst_13 {dimension_numbers = #tpu.dot_dimension_numbers<[1], [0], [0], [1], [0, 0, 1, 1], [], []>} : vector<16x128xbf16>, vector<128x128xbf16>, vector<16x128xf32> -> vector<16x128xf32>
    %c0_14 = arith.constant 0 : index
    %c0_15 = arith.constant 0 : index
    %17 = vector.load %arg7[%c0_14, %c0_15] : memref<1x128xf32, #tpu.memory_space<vmem>>, vector<1x128xf32>
    %18 = vector.broadcast %17 : vector<1x128xf32> to vector<16x128xf32>
    %19 = arith.addf %16, %18 : vector<16x128xf32>
    %cst_16 = arith.constant 0.000000e+00 : f32
    %20 = vector.broadcast %cst_16 : f32 to vector<16x128xf32>
    %21 = arith.maximumf %19, %20 : vector<16x128xf32>
    %22 = arith.truncf %21 : vector<16x128xf32> to vector<16x128xbf16>
    %c0_17 = arith.constant 0 : index
    %c0_18 = arith.constant 0 : index
    %23 = vector.load %arg8[%c0_17, %c0_18] : memref<128x16xbf16, #tpu.memory_space<vmem>>, vector<128x16xbf16>
    %cst_19 = arith.constant dense<0.000000e+00> : vector<16x16xf32>
    %24 = tpu.matmul %22, %23, %cst_19 {dimension_numbers = #tpu.dot_dimension_numbers<[1], [0], [0], [1], [0, 0, 1, 1], [], []>} : vector<16x128xbf16>, vector<128x16xbf16>, vector<16x16xf32> -> vector<16x16xf32>
    %c0_20 = arith.constant 0 : index
    %c0_21 = arith.constant 0 : index
    %25 = vector.load %arg9[%c0_20, %c0_21] : memref<1x16xf32, #tpu.memory_space<vmem>>, vector<1x16xf32>
    %26 = vector.broadcast %25 : vector<1x16xf32> to vector<16x16xf32>
    %27 = arith.addf %24, %26 : vector<16x16xf32>
    %c0_22 = arith.constant 0 : index
    %c0_23 = arith.constant 0 : index
    %28 = vector.load %arg10[%c0_22, %c0_23] : memref<16x16xf32, #tpu.memory_space<vmem>>, vector<16x16xf32>
    tpu.vector_store %arg10[%c0_22, %c0_23], %27 {strides = array<i32>} : memref<16x16xf32, #tpu.memory_space<vmem>>, vector<16x16xf32>,
    return
  }
  func.func @transform_0(%arg0: i32) -> (i32, i32) {
    %c0_i32 = arith.constant 0 : i32
    %c0_i32_0 = arith.constant 0 : i32
    return %arg0, %c0_i32 : i32, i32
  }
  func.func @transform_1(%arg0: i32) -> (i32, i32) {
    %c0_i32 = arith.constant 0 : i32
    %c0_i32_0 = arith.constant 0 : i32
    return %arg0, %c0_i32 : i32, i32
  }
  func.func @transform_2(%arg0: i32) -> (i32, i32) {
    %c0_i32 = arith.constant 0 : i32
    %c0_i32_0 = arith.constant 0 : i32
    %c0_i32_1 = arith.constant 0 : i32
    return %c0_i32, %c0_i32_0 : i32, i32
  }
  func.func @transform_3(%arg0: i32) -> (i32, i32) {
    %c0_i32 = arith.constant 0 : i32
    %c0_i32_0 = arith.constant 0 : i32
    %c0_i32_1 = arith.constant 0 : i32
    return %c0_i32, %c0_i32_0 : i32, i32
  }
  func.func @transform_4(%arg0: i32) -> (i32, i32) {
    %c0_i32 = arith.constant 0 : i32
    %c0_i32_0 = arith.constant 0 : i32
    %c0_i32_1 = arith.constant 0 : i32
    return %c0_i32, %c0_i32_0 : i32, i32
  }
  func.func @transform_5(%arg0: i32) -> (i32, i32) {
    %c0_i32 = arith.constant 0 : i32
    %c0_i32_0 = arith.constant 0 : i32
    %c0_i32_1 = arith.constant 0 : i32
    return %c0_i32, %c0_i32_0 : i32, i32
  }
  func.func @transform_6(%arg0: i32) -> (i32, i32) {
    %c0_i32 = arith.constant 0 : i32
    %c0_i32_0 = arith.constant 0 : i32
    %c0_i32_1 = arith.constant 0 : i32
    return %c0_i32, %c0_i32_0 : i32, i32
  }
  func.func @transform_7(%arg0: i32) -> (i32, i32) {
    %c0_i32 = arith.constant 0 : i32
    %c0_i32_0 = arith.constant 0 : i32
    %c0_i32_1 = arith.constant 0 : i32
    return %c0_i32, %c0_i32_0 : i32, i32
  }
  func.func @transform_8(%arg0: i32) -> (i32, i32) {
    %c0_i32 = arith.constant 0 : i32
    %c0_i32_0 = arith.constant 0 : i32
    %c0_i32_1 = arith.constant 0 : i32
    return %c0_i32, %c0_i32_0 : i32, i32
  }
  func.func @transform_9(%arg0: i32) -> (i32, i32) {
    %c0_i32 = arith.constant 0 : i32
    %c0_i32_0 = arith.constant 0 : i32
    return %arg0, %c0_i32 : i32, i32
  }
}

</mosaic_0001>

<bundles_post_ra>
// kernel: latent_action_generator_forward.1
= control target key start
LH: loop header
LB: loop body
LE: loop exit
PB: predicated region body
PF: predicated region fallthrough
CT: control target
= control target key end

     0   :  { %14 = vsyncpa [#allocation3], 0  ;;  %s709_s0 = inlined_call_operand.vmem [shape: f32[16,16], index: 0, kind: input, shape index: {}]   ;;  %s710_s1 = inlined_call_operand.vmem [shape: f32[16,16], index: 1, kind: input, shape index: {}]   ;;  %s711_s2 = inlined_call_operand.vmem [shape: bf16[16,128], index: 2, kind: input, shape index: {}]   ;;  %s712_s3 = inlined_call_operand.vmem [shape: bf16[16,128], index: 3, kind: input, shape index: {}]   ;;  %s713_s4 = inlined_call_operand.vmem [shape: f32[1,128], index: 4, kind: input, shape index: {}]   ;;  %s714_s5 = inlined_call_operand.hbm [shape: bf16[128,128], index: 5, kind: input, shape index: {}]   ;;  %s715_s6 = inlined_call_operand.vmem [shape: f32[1,128], index: 6, kind: input, shape index: {}]   ;;  %s716_s7 = inlined_call_operand.hbm [shape: bf16[128,16], index: 7, kind: input, shape index: {}]   ;;  %s717_s8 = inlined_call_operand.vmem [shape: f32[1,16], index: 8, kind: input, shape index: {}]   ;;  %s718_s9 = inlined_call_operand.vmem [shape: f32[16,16], index: 9, kind: output, shape index: {}]  }
   0x1   :  { %15 = vsyncpa [#allocation5], 0  ;;  %s584_s30 = smov [#allocation2]  }
   0x2   :  { %s31_s10 = sshll.u32 %s584_s30, 4  ;;  %s32_s10 = int_to_ptr.vmem [resolvable:$true] %s31_s10 }
   0x3   :  { %s548_s11 = scalar_lea.vmem %s32_s10, 1024  ;;  %p553_p1 = scmp.lt.s32.totalorder %s32_s10, %s32_s10 }
   0x4   :  { %p549_p0 = scmp.ne.s32.totalorder %s32_s10, %s548_s11  ;;  %p554_p2 = scmp.lt.s32.totalorder %s548_s11, %s548_s11 }
   0x6   :  { %p555_p3 = por %p554_p2, %p553_p1 }
   0x8   :  { %p556_p4 = pnand %p555_p3, %p549_p0 }
   0xa   :  { %559 = shalt.err (!%p556_p4)
}
   0xb   :  { %s585_s12 = smov 64   ;;  %s586_s13 = smov 4  }
   0xc   :  { %37 = dma.hbm_to_vmem [thread:$0]  %s714_s5, 1024, %s32_s10, [#allocation3], %s585_s12, %s585_s12, %s586_s13  }
   0xd   :  { %s587_s16 = smov [#allocation4]  }
   0xe   :  { %s45_s17 = sshll.u32 %s587_s16, 4  ;;  %s46_s17 = int_to_ptr.vmem [resolvable:$true] %s45_s17 }
   0xf   :  { %s568_s18 = scalar_lea.vmem %s46_s17, 1024  ;;  %p573_p6 = scmp.lt.s32.totalorder %s46_s17, %s46_s17 }
  0x10   :  { %p569_p5 = scmp.ne.s32.totalorder %s46_s17, %s568_s18  ;;  %p574_p7 = scmp.lt.s32.totalorder %s568_s18, %s568_s18 }
  0x12   :  { %p575_p8 = por %p574_p7, %p573_p6 }
  0x14   :  { %p576_p9 = pnand %p575_p8, %p569_p5 }
  0x16   :  { %579 = shalt.err (!%p576_p9)
}
  0x17   :  { %51 = dma.hbm_to_vmem [thread:$0]  %s716_s7, 1024, %s46_s17, [#allocation5], %s585_s12, %s585_s12, %s586_s13  }
  0x18   :  { %580 = dma.done.wait [#allocation3], 1024  }
  0x19   :  { %581 = vsyncadd [#allocation3], 4294966272 }
  0x1a   :  { %582 = dma.done.wait [#allocation5], 1024  }
  0x1b   :  { %583 = vsyncadd [#allocation5], 4294966272  ;;  %v588_v0 = vmov 0.0   ;;  %vm589_vm0 = vmmov 0   ;;  %v522_v1 = vld [vmem:[%s712_s3] sm:$0xff]   ;;  %v65_v4 = vld [vmem:[%s710_s1 + $0x8] sm:$0xff] }
  0x1c   :  { %464 = vmatprep.subr.bf16.mxu0 %v588_v0  ;;  %470 = vmatprep.subr.bf16.mxu1 %v588_v0  ;;  %v523_v2 = vld [vmem:[%s711_s2] sm:$0xff]   ;;  %vm77_vm1 = vcmask 130048   ;;  %v62_v7 = vld [vmem:[%s709_s0 + $0x8] sm:$0xff]  ;;  %v524_v9 = vld [vmem:[#allocation2 + $0x38] sm:$0xff]  }
  0x1d   :  { %466 = vmatprep.mubr.msk.bf16.mxu0 %vm589_vm0, %v588_v0  ;;  %472 = vmatprep.mubr.msk.bf16.mxu1 %vm589_vm0, %v588_v0  ;;  %v64_v3 = vld [vmem:[%s710_s1] sm:$0xff]  ;;  %v525_v10 = vld [vmem:[#allocation2 + $0x30] sm:$0xff]   ;;  %v526_v11 = vld [vmem:[#allocation2 + $0x28] sm:$0xff]  }
  0x1e   :  { %465 = vmatpush3.bf16.msra.mxu0 %v522_v1  ;;  %v61_v5 = vld [vmem:[%s709_s0] sm:$0xff]  ;;  %471 = vmatpush3.bf16.msra.mxu1 %v523_v2  ;;  %v66_v6 = vpack.c.bf16 %v65_v4, %v64_v3  ;;  %v528_v13 = vld [vmem:[#allocation2 + $0x18] sm:$0xff]   ;;  %v529_v14 = vld [vmem:[#allocation2 + $0x10] sm:$0xff]  }
  0x1f   :  { %476 = vmatprep.subr.bf16.mxu0 %v588_v0  ;;  %v63_v8 = vpack.c.bf16 %v62_v7, %v61_v5  ;;  %496 = vmatprep.subr.bf16.mxu1 %v588_v0  ;;  %v527_v12 = vld [vmem:[#allocation2 + $0x20] sm:$0xff]   ;;  %v530_v15 = vld [vmem:[#allocation2 + $0x8] sm:$0xff]   ;;  %v532_v17 = vld [vmem:[#allocation4 + $0x38] sm:$0xff]  }
  0x20   :  { %v531_v16 = vld [vmem:[#allocation2] sm:$0xff]   ;;  %v533_v18 = vld [vmem:[#allocation4 + $0x30] sm:$0xff]   ;;  %v534_v19 = vld [vmem:[#allocation4 + $0x28] sm:$0xff]  }
  0x21   :  { %467 = vmatmul.mubr.msk.bf16.vlgmr.msra.gmra.mxu0 %vm77_vm1, %v66_v6  ;;  %473 = vmatmul.mubr.msk.bf16.vlgmr.msra.gmra.mxu1 %vm77_vm1, %v63_v8  ;;  %v535_v20 = vld [vmem:[#allocation4 + $0x20] sm:$0xff]   ;;  %v536_v21 = vld [vmem:[#allocation4 + $0x18] sm:$0xff]   ;;  %v537_v38 = vld [vmem:[#allocation4 + $0x10] sm:$0xff]  }
  0x22   :  { %477 = vmatpush3.bf16.msra.mxu0 %v524_v9  ;;  %492 = vmatprep.mubr.msk.bf16.mxu0 %vm589_vm0, %v588_v0  ;;  %v423_v26 = vld [vmem:[%s713_s4] ss:$0 sm:$0xff]  ;;  %v538_v39 = vld [vmem:[#allocation4 + $0x8] sm:$0xff]  }
  0x23   :  { %478 = vmatprep.subr.bf16.mxu0 %v588_v0  ;;  %512 = vmatprep.mubr.msk.bf16.mxu1 %vm589_vm0, %v588_v0  ;;  %v539_v40 = vld [vmem:[#allocation4] sm:$0xff]  }
  0x24   :  { %497 = vmatpush3.bf16.msra.mxu1 %v532_v17  ;;  %v424_v41 = vld [vmem:[%s715_s6] ss:$0 sm:$0xff] }
  0x25   :  { %498 = vmatprep.subr.bf16.mxu1 %v588_v0  ;;  %v433_v51 = vld [vmem:[%s717_s8] ss:$0 sm:$0xff] }
  0x26   :  { %479 = vmatpush3.bf16.msra.mxu0 %v525_v10 }
  0x27   :  { %480 = vmatprep.subr.bf16.mxu0 %v588_v0 }
  0x28   :  { %499 = vmatpush3.bf16.msra.mxu1 %v533_v18 }
  0x29   :  { %500 = vmatprep.subr.bf16.mxu1 %v588_v0 }
  0x2a   :  { %481 = vmatpush3.bf16.msra.mxu0 %v526_v11 }
  0x2b   :  { %482 = vmatprep.subr.bf16.mxu0 %v588_v0 }
  0x2c   :  { %501 = vmatpush3.bf16.msra.mxu1 %v534_v19 }
  0x2d   :  { %502 = vmatprep.subr.bf16.mxu1 %v588_v0 }
  0x2e   :  { %483 = vmatpush3.bf16.msra.mxu0 %v527_v12 }
  0x2f   :  { %484 = vmatprep.subr.bf16.mxu0 %v588_v0 }
  0x30   :  { %503 = vmatpush3.bf16.msra.mxu1 %v535_v20 }
  0x31   :  { %504 = vmatprep.subr.bf16.mxu1 %v588_v0 }
  0x32   :  { %485 = vmatpush3.bf16.msra.mxu0 %v528_v13 }
  0x33   :  { %486 = vmatprep.subr.bf16.mxu0 %v588_v0 }
  0x34   :  { %505 = vmatpush3.bf16.msra.mxu1 %v536_v21 }
  0x35   :  { %506 = vmatprep.subr.bf16.mxu1 %v588_v0 }
  0x36   :  { %487 = vmatpush3.bf16.msra.mxu0 %v529_v14 }
  0x37   :  { %488 = vmatprep.subr.bf16.mxu0 %v588_v0 }
  0x38   :  { %507 = vmatpush3.bf16.msra.mxu1 %v537_v38 }
  0x39   :  { %508 = vmatprep.subr.bf16.mxu1 %v588_v0 }
  0x3a   :  { %489 = vmatpush3.bf16.msra.mxu0 %v530_v15 }
  0x3b   :  { %490 = vmatprep.subr.bf16.mxu0 %v588_v0 }
  0x3c   :  { %509 = vmatpush3.bf16.msra.mxu1 %v538_v39 }
  0x3d   :  { %510 = vmatprep.subr.bf16.mxu1 %v588_v0 }
  0x3e   :  { %491 = vmatpush3.bf16.msra.mxu0 %v531_v16 }
  0x40   :  { %511 = vmatpush3.bf16.msra.mxu1 %v539_v40 }
  0xe1   :  { %v115_v22 = vpop.f32.mrf.mxu0  ;;  %v165_v23 = vpop.f32.mrf.mxu1 }
  0xe2   :  { %v166_v24 = vadd.f32 %v165_v23, %v115_v22 }
  0xe3   :  { %v468_v25 = vpop.f32.mrf.mxu0  ;;  %v474_v27 = vpop.f32.mrf.mxu1 }
  0xe4   :  { %v179_v30 = vadd.f32 %v423_v26, %v166_v24 }
  0xe5   :  { %v118_v28 = vpop.f32.mrf.mxu0  ;;  %v168_v29 = vpop.f32.mrf.mxu1 }
  0xe6   :  { %v169_v31 = vadd.f32 %v168_v29, %v118_v28  ;;  %v181_v35 = vmax.f32 %v179_v30, 0.0 }
  0xe7   :  { %v469_v32 = vpop.f32.mrf.mxu0  ;;  %v475_v33 = vpop.f32.mrf.mxu1 }
  0xe8   :  { %v180_v34 = vadd.f32 %v423_v26, %v169_v31 }
  0xea   :  { %v182_v36 = vmax.f32 %v180_v34, 0.0 }
  0xec   :  { %v183_v37 = vpack.c.bf16 %v182_v36, %v181_v35 }
  0xee   :  { %493 = vmatmul.mubr.bf16.vlgmr.msra.gmra.mxu0 %v183_v37 }
 0x1ae   :  { %v289_v42 = vpop.f32.mrf.mxu0 }
 0x1af   :  { %v290_v44 = vadd.f32 %v424_v41, %v289_v42 }
 0x1b0   :  { %v494_v43 = vpop.f32.mrf.mxu0 }
 0x1b1   :  { %v296_v48 = vmax.f32 %v290_v44, 0.0 }
 0x1b2   :  { %v292_v45 = vpop.f32.mrf.mxu0 }
 0x1b3   :  { %v293_v46 = vadd.f32 %v424_v41, %v292_v45 }
 0x1b4   :  { %v495_v47 = vpop.f32.mrf.mxu0 }
 0x1b5   :  { %v297_v49 = vmax.f32 %v293_v46, 0.0 }
 0x1b7   :  { %v298_v50 = vpack.c.bf16 %v297_v49, %v296_v48 }
 0x1b9   :  { %513 = vmatmul.mubr.bf16.vlgmr.msra.gmra.mxu1 %v298_v50 }
 0x279   :  { %v404_v52 = vpop.f32.mrf.mxu1 }
 0x27a   :  { %v405_v53 = vadd.f32 %v433_v51, %v404_v52 }
 0x27b   :  { %v514_v54 = vpop.f32.mrf.mxu1 }
 0x27c   :  { %411 = vst.msk [vmem:[%s718_s9] sm:$0xff] %vm77_vm1, %v405_v53 }
 0x27d   :  { %v407_v55 = vpop.f32.mrf.mxu1 }
 0x27e   :  { %v408_v56 = vadd.f32 %v433_v51, %v407_v55 }
 0x27f   :  { %v515_v57 = vpop.f32.mrf.mxu1 }
 0x280   :  { %412 = vst.msk [vmem:[%s718_s9 + $0x8] sm:$0xff] %vm77_vm1, %v408_v56 }
 0x281   :  { %417 = vsyncpa [#allocation3], 1 }
 0x282   :  { %418 = vsyncpa [#allocation5], 1 }

// kernel: latent_action_generator_forward.1
= control target key start
LH: loop header
LB: loop body
LE: loop exit
PB: predicated region body
PF: predicated region fallthrough
CT: control target
= control target key end

     0   :  { %14 = vsyncpa [#allocation3], 0  ;;  %s709_s0 = inlined_call_operand.vmem [shape: f32[16,16], index: 0, kind: input, shape index: {}]   ;;  %s710_s1 = inlined_call_operand.vmem [shape: f32[16,16], index: 1, kind: input, shape index: {}]   ;;  %s711_s2 = inlined_call_operand.vmem [shape: bf16[16,128], index: 2, kind: input, shape index: {}]   ;;  %s712_s3 = inlined_call_operand.vmem [shape: bf16[16,128], index: 3, kind: input, shape index: {}]   ;;  %s713_s4 = inlined_call_operand.vmem [shape: f32[1,128], index: 4, kind: input, shape index: {}]   ;;  %s714_s5 = inlined_call_operand.hbm [shape: bf16[128,128], index: 5, kind: input, shape index: {}]   ;;  %s715_s6 = inlined_call_operand.vmem [shape: f32[1,128], index: 6, kind: input, shape index: {}]   ;;  %s716_s7 = inlined_call_operand.hbm [shape: bf16[128,16], index: 7, kind: input, shape index: {}]   ;;  %s717_s8 = inlined_call_operand.vmem [shape: f32[1,16], index: 8, kind: input, shape index: {}]   ;;  %s718_s9 = inlined_call_operand.vmem [shape: f32[16,16], index: 9, kind: output, shape index: {}]  }
   0x1   :  { %15 = vsyncpa [#allocation5], 0  ;;  %s584_s30 = smov [#allocation2]  }
   0x2   :  { %s31_s10 = sshll.u32 %s584_s30, 4  ;;  %s32_s10 = int_to_ptr.vmem [resolvable:$true] %s31_s10 }
   0x3   :  { %s548_s11 = scalar_lea.vmem %s32_s10, 1024  ;;  %p553_p1 = scmp.lt.s32.totalorder %s32_s10, %s32_s10 }
   0x4   :  { %p549_p0 = scmp.ne.s32.totalorder %s32_s10, %s548_s11  ;;  %p554_p2 = scmp.lt.s32.totalorder %s548_s11, %s548_s11 }
   0x6   :  { %p555_p3 = por %p554_p2, %p553_p1 }
   0x8   :  { %p556_p4 = pnand %p555_p3, %p549_p0 }
   0xa   :  { %559 = shalt.err (!%p556_p4)
}
   0xb   :  { %s585_s12 = smov 64   ;;  %s586_s13 = smov 4  }
   0xc   :  { %37 = dma.hbm_to_vmem [thread:$0]  %s714_s5, 1024, %s32_s10, [#allocation3], %s585_s12, %s585_s12, %s586_s13  }
   0xd   :  { %s587_s16 = smov [#allocation4]  }
   0xe   :  { %s45_s17 = sshll.u32 %s587_s16, 4  ;;  %s46_s17 = int_to_ptr.vmem [resolvable:$true] %s45_s17 }
   0xf   :  { %s568_s18 = scalar_lea.vmem %s46_s17, 1024  ;;  %p573_p6 = scmp.lt.s32.totalorder %s46_s17, %s46_s17 }
  0x10   :  { %p569_p5 = scmp.ne.s32.totalorder %s46_s17, %s568_s18  ;;  %p574_p7 = scmp.lt.s32.totalorder %s568_s18, %s568_s18 }
  0x12   :  { %p575_p8 = por %p574_p7, %p573_p6 }
  0x14   :  { %p576_p9 = pnand %p575_p8, %p569_p5 }
  0x16   :  { %579 = shalt.err (!%p576_p9)
}
  0x17   :  { %51 = dma.hbm_to_vmem [thread:$0]  %s716_s7, 1024, %s46_s17, [#allocation5], %s585_s12, %s585_s12, %s586_s13  }
  0x18   :  { %580 = dma.done.wait [#allocation3], 1024  }
  0x19   :  { %581 = vsyncadd [#allocation3], 4294966272 }
  0x1a   :  { %582 = dma.done.wait [#allocation5], 1024  }
  0x1b   :  { %583 = vsyncadd [#allocation5], 4294966272  ;;  %v588_v0 = vmov 0.0   ;;  %vm589_vm0 = vmmov 0   ;;  %v522_v1 = vld [vmem:[%s712_s3] sm:$0xff]   ;;  %v65_v4 = vld [vmem:[%s710_s1 + $0x8] sm:$0xff] }
  0x1c   :  { %464 = vmatprep.subr.bf16.mxu0 %v588_v0  ;;  %470 = vmatprep.subr.bf16.mxu1 %v588_v0  ;;  %v523_v2 = vld [vmem:[%s711_s2] sm:$0xff]   ;;  %vm77_vm1 = vcmask 130048   ;;  %v62_v7 = vld [vmem:[%s709_s0 + $0x8] sm:$0xff]  ;;  %v524_v9 = vld [vmem:[#allocation2 + $0x38] sm:$0xff]  }
  0x1d   :  { %466 = vmatprep.mubr.msk.bf16.mxu0 %vm589_vm0, %v588_v0  ;;  %472 = vmatprep.mubr.msk.bf16.mxu1 %vm589_vm0, %v588_v0  ;;  %v64_v3 = vld [vmem:[%s710_s1] sm:$0xff]  ;;  %v525_v10 = vld [vmem:[#allocation2 + $0x30] sm:$0xff]   ;;  %v526_v11 = vld [vmem:[#allocation2 + $0x28] sm:$0xff]  }
  0x1e   :  { %465 = vmatpush3.bf16.msra.mxu0 %v522_v1  ;;  %v61_v5 = vld [vmem:[%s709_s0] sm:$0xff]  ;;  %471 = vmatpush3.bf16.msra.mxu1 %v523_v2  ;;  %v66_v6 = vpack.c.bf16 %v65_v4, %v64_v3  ;;  %v528_v13 = vld [vmem:[#allocation2 + $0x18] sm:$0xff]   ;;  %v529_v14 = vld [vmem:[#allocation2 + $0x10] sm:$0xff]  }
  0x1f   :  { %476 = vmatprep.subr.bf16.mxu0 %v588_v0  ;;  %v63_v8 = vpack.c.bf16 %v62_v7, %v61_v5  ;;  %496 = vmatprep.subr.bf16.mxu1 %v588_v0  ;;  %v527_v12 = vld [vmem:[#allocation2 + $0x20] sm:$0xff]   ;;  %v530_v15 = vld [vmem:[#allocation2 + $0x8] sm:$0xff]   ;;  %v532_v17 = vld [vmem:[#allocation4 + $0x38] sm:$0xff]  }
  0x20   :  { %v531_v16 = vld [vmem:[#allocation2] sm:$0xff]   ;;  %v533_v18 = vld [vmem:[#allocation4 + $0x30] sm:$0xff]   ;;  %v534_v19 = vld [vmem:[#allocation4 + $0x28] sm:$0xff]  }
  0x21   :  { %467 = vmatmul.mubr.msk.bf16.vlgmr.msra.gmra.mxu0 %vm77_vm1, %v66_v6  ;;  %473 = vmatmul.mubr.msk.bf16.vlgmr.msra.gmra.mxu1 %vm77_vm1, %v63_v8  ;;  %v535_v20 = vld [vmem:[#allocation4 + $0x20] sm:$0xff]   ;;  %v536_v21 = vld [vmem:[#allocation4 + $0x18] sm:$0xff]   ;;  %v537_v38 = vld [vmem:[#allocation4 + $0x10] sm:$0xff]  }
  0x22   :  { %477 = vmatpush3.bf16.msra.mxu0 %v524_v9  ;;  %492 = vmatprep.mubr.msk.bf16.mxu0 %vm589_vm0, %v588_v0  ;;  %v423_v26 = vld [vmem:[%s713_s4] ss:$0 sm:$0xff]  ;;  %v538_v39 = vld [vmem:[#allocation4 + $0x8] sm:$0xff]  }
  0x23   :  { %478 = vmatprep.subr.bf16.mxu0 %v588_v0  ;;  %512 = vmatprep.mubr.msk.bf16.mxu1 %vm589_vm0, %v588_v0  ;;  %v539_v40 = vld [vmem:[#allocation4] sm:$0xff]  }
  0x24   :  { %497 = vmatpush3.bf16.msra.mxu1 %v532_v17  ;;  %v424_v41 = vld [vmem:[%s715_s6] ss:$0 sm:$0xff] }
  0x25   :  { %498 = vmatprep.subr.bf16.mxu1 %v588_v0  ;;  %v433_v51 = vld [vmem:[%s717_s8] ss:$0 sm:$0xff] }
  0x26   :  { %479 = vmatpush3.bf16.msra.mxu0 %v525_v10 }
  0x27   :  { %480 = vmatprep.subr.bf16.mxu0 %v588_v0 }
  0x28   :  { %499 = vmatpush3.bf16.msra.mxu1 %v533_v18 }
  0x29   :  { %500 = vmatprep.subr.bf16.mxu1 %v588_v0 }
  0x2a   :  { %481 = vmatpush3.bf16.msra.mxu0 %v526_v11 }
  0x2b   :  { %482 = vmatprep.subr.bf16.mxu0 %v588_v0 }
  0x2c   :  { %501 = vmatpush3.bf16.msra.mxu1 %v534_v19 }
  0x2d   :  { %502 = vmatprep.subr.bf16.mxu1 %v588_v0 }
  0x2e   :  { %483 = vmatpush3.bf16.msra.mxu0 %v527_v12 }
  0x2f   :  { %484 = vmatprep.subr.bf16.mxu0 %v588_v0 }
  0x30   :  { %503 = vmatpush3.bf16.msra.mxu1 %v535_v20 }
  0x31   :  { %504 = vmatprep.subr.bf16.mxu1 %v588_v0 }
  0x32   :  { %485 = vmatpush3.bf16.msra.mxu0 %v528_v13 }
  0x33   :  { %486 = vmatprep.subr.bf16.mxu0 %v588_v0 }
  0x34   :  { %505 = vmatpush3.bf16.msra.mxu1 %v536_v21 }
  0x35   :  { %506 = vmatprep.subr.bf16.mxu1 %v588_v0 }
  0x36   :  { %487 = vmatpush3.bf16.msra.mxu0 %v529_v14 }
  0x37   :  { %488 = vmatprep.subr.bf16.mxu0 %v588_v0 }
  0x38   :  { %507 = vmatpush3.bf16.msra.mxu1 %v537_v38 }
  0x39   :  { %508 = vmatprep.subr.bf16.mxu1 %v588_v0 }
  0x3a   :  { %489 = vmatpush3.bf16.msra.mxu0 %v530_v15 }
  0x3b   :  { %490 = vmatprep.subr.bf16.mxu0 %v588_v0 }
  0x3c   :  { %509 = vmatpush3.bf16.msra.mxu1 %v538_v39 }
  0x3d   :  { %510 = vmatprep.subr.bf16.mxu1 %v588_v0 }
  0x3e   :  { %491 = vmatpush3.bf16.msra.mxu0 %v531_v16 }
  0x40   :  { %511 = vmatpush3.bf16.msra.mxu1 %v539_v40 }
  0xe1   :  { %v115_v22 = vpop.f32.mrf.mxu0  ;;  %v165_v23 = vpop.f32.mrf.mxu1 }
  0xe2   :  { %v166_v24 = vadd.f32 %v165_v23, %v115_v22 }
  0xe3   :  { %v468_v25 = vpop.f32.mrf.mxu0  ;;  %v474_v27 = vpop.f32.mrf.mxu1 }
  0xe4   :  { %v179_v30 = vadd.f32 %v423_v26, %v166_v24 }
  0xe5   :  { %v118_v28 = vpop.f32.mrf.mxu0  ;;  %v168_v29 = vpop.f32.mrf.mxu1 }
  0xe6   :  { %v169_v31 = vadd.f32 %v168_v29, %v118_v28  ;;  %v181_v35 = vmax.f32 %v179_v30, 0.0 }
  0xe7   :  { %v469_v32 = vpop.f32.mrf.mxu0  ;;  %v475_v33 = vpop.f32.mrf.mxu1 }
  0xe8   :  { %v180_v34 = vadd.f32 %v423_v26, %v169_v31 }
  0xea   :  { %v182_v36 = vmax.f32 %v180_v34, 0.0 }
  0xec   :  { %v183_v37 = vpack.c.bf16 %v182_v36, %v181_v35 }
  0xee   :  { %493 = vmatmul.mubr.bf16.vlgmr.msra.gmra.mxu0 %v183_v37 }
 0x1ae   :  { %v289_v42 = vpop.f32.mrf.mxu0 }
 0x1af   :  { %v290_v44 = vadd.f32 %v424_v41, %v289_v42 }
 0x1b0   :  { %v494_v43 = vpop.f32.mrf.mxu0 }
 0x1b1   :  { %v296_v48 = vmax.f32 %v290_v44, 0.0 }
 0x1b2   :  { %v292_v45 = vpop.f32.mrf.mxu0 }
 0x1b3   :  { %v293_v46 = vadd.f32 %v424_v41, %v292_v45 }
 0x1b4   :  { %v495_v47 = vpop.f32.mrf.mxu0 }
 0x1b5   :  { %v297_v49 = vmax.f32 %v293_v46, 0.0 }
 0x1b7   :  { %v298_v50 = vpack.c.bf16 %v297_v49, %v296_v48 }
 0x1b9   :  { %513 = vmatmul.mubr.bf16.vlgmr.msra.gmra.mxu1 %v298_v50 }
 0x279   :  { %v404_v52 = vpop.f32.mrf.mxu1 }
 0x27a   :  { %v405_v53 = vadd.f32 %v433_v51, %v404_v52 }
 0x27b   :  { %v514_v54 = vpop.f32.mrf.mxu1 }
 0x27c   :  { %411 = vst.msk [vmem:[%s718_s9] sm:$0xff] %vm77_vm1, %v405_v53 }
 0x27d   :  { %v407_v55 = vpop.f32.mrf.mxu1 }
 0x27e   :  { %v408_v56 = vadd.f32 %v433_v51, %v407_v55 }
 0x27f   :  { %v515_v57 = vpop.f32.mrf.mxu1 }
 0x280   :  { %412 = vst.msk [vmem:[%s718_s9 + $0x8] sm:$0xff] %vm77_vm1, %v408_v56 }
 0x281   :  { %417 = vsyncpa [#allocation3], 1 }
 0x282   :  { %418 = vsyncpa [#allocation5], 1 }

</bundles_post_ra>
